<compile_context>
chip_gen: v7x
topology: tpu7x:2x2x1
jax: 0.10.0
libtpu: 0.0.40
codegen_flags: <defaults>
</compile_context>

<pallas_src>
import functools

import jax
import jax.numpy as jnp
from jax.experimental import pallas as pl
from jax.experimental.pallas import tpu as pltpu


def _make_kernel(clip_lo: float, clip_hi: float):
    """Kernel body with the (post-fold) clip bounds as compile-time immediates."""

    def kernel(scale_ref, bias_ref, x_ref, o_ref):
        # x_ref:     (TR, TL) lane-dense slab of pixels (rows = sample*channel)
        # scale_ref: (TR, 1)  per-row  gamma / (255*std)
        # bias_ref:  (TR, 1)  per-row  gamma*(-mean/std) + beta
        x = x_ref[...].astype(jnp.float32)

        # per_sample_transform (_Sequential) + per_batch_transform, fully fused:
        #   clamp((x/255 - mean)/std, -3, 3)*gamma + beta
        #     == clip(x*scale + bias, lo, hi)   with folded scale/bias/bounds.
        x = x * scale_ref[...] + bias_ref[...]

        # collate_fn: stacking is realized by the flattened (N*C, H*W) layout +
        # the tiled output BlockSpec (each grid step writes its own batch slab).
        o_ref[...] = jnp.clip(x, clip_lo, clip_hi).astype(o_ref.dtype)

    return kernel


def _choose_tiles(rows: int, lanes: int, in_bytes: int, out_bytes: int,
                  target_tile_bytes: int = 4 * 1024 * 1024):
    """Pick (TR, TL) obeying the (8, 128) constraint with ~target-sized tiles."""
    max_bpe = max(in_bytes, out_bytes)

    # Lane tile: prefer the full lane extent (always a legal block dim); only
    # split it if even an 8-row tile would blow past the target size.
    if lanes <= 512 or lanes * 8 * max_bpe <= target_tile_bytes:
        tl = lanes
    else:
        tl = max(128, (target_tile_bytes // (8 * max_bpe) // 128) * 128)
        tl = min(tl, (lanes // 128) * 128)

    # Row tile: grow toward the target footprint; multiple of 8 unless it
    # covers the full row extent.
    per_row_bytes = tl * max_bpe
    tr = max(1, target_tile_bytes // per_row_bytes)
    if tr >= rows:
        tr = rows
    else:
        tr = max(8, (tr // 8) * 8)
    return tr, tl


@functools.partial(jax.jit, static_argnames=("gamma", "beta", "out_dtype"))
def preprocessor_forward(samples, mean, std, gamma, beta, out_dtype=jnp.float32):
    """samples: (N, C, H, W) raw pixel values (the collated sample list).
    mean/std: (C,) per-channel stats. gamma/beta: python floats."""
    N, C, H, W = samples.shape
    R, L = N * C, H * W
    gamma = float(gamma)
    beta = float(beta)

    # Lane-dense 2-D slab: rows = (sample, channel), lanes = H*W.
    x2d = samples.reshape(R, L)

    # Fold pre_tensor_transform (1/255), post_tensor_transform ((x-mean)/std)
    # AND the per_batch affine (gamma*x + beta, pushed through the clamp) into
    # one per-row scale/bias pair + static clip bounds.
    inv_std = 1.0 / std.astype(jnp.float32)
    scale_c = (gamma / 255.0) * inv_std                                  # (C,)
    bias_c = gamma * (-mean.astype(jnp.float32) * inv_std) + beta        # (C,)
    scale_r = jnp.tile(scale_c, N).reshape(R, 1)                         # row = n*C + c
    bias_r = jnp.tile(bias_c, N).reshape(R, 1)
    clip_lo = min(-3.0 * gamma + beta, 3.0 * gamma + beta)
    clip_hi = max(-3.0 * gamma + beta, 3.0 * gamma + beta)

    in_bytes = jnp.dtype(samples.dtype).itemsize
    out_bytes = jnp.dtype(out_dtype).itemsize
    tr, tl = _choose_tiles(R, L, in_bytes, out_bytes)
    grid = (pl.cdiv(R, tr), pl.cdiv(L, tl))

    out2d = pl.pallas_call(
        _make_kernel(clip_lo, clip_hi),
        out_shape=jax.ShapeDtypeStruct((R, L), out_dtype),
        grid_spec=pltpu.PrefetchScalarGridSpec(
            num_scalar_prefetch=0,
            grid=grid,
            in_specs=[
                pl.BlockSpec((tr, 1), lambda r, l: (r, 0)),   # per-row scale
                pl.BlockSpec((tr, 1), lambda r, l: (r, 0)),   # per-row bias
                pl.BlockSpec((tr, tl), lambda r, l: (r, l)),  # pixel slab
            ],
            out_specs=pl.BlockSpec((tr, tl), lambda r, l: (r, l)),
        ),
        compiler_params=pltpu.CompilerParams(
            # Both axes independent -> megacore-shardable on v7x.
            dimension_semantics=("parallel", "parallel"),
            # Large double-buffered tiles need more than v5e's 16 MiB default
            # scoped VMEM; 32 MiB is comfortably inside every generation.
            vmem_limit_bytes=32 * 1024 * 1024,
        ),
    )(scale_r, bias_r, x2d)

    return out2d.reshape(N, C, H, W)


def _reference_forward(samples, mean, std, gamma, beta):
    # Pure-JAX replica of _PreProcessor.forward semantics for this pipeline
    # (kept in the original, un-folded order to validate the algebraic fold).
    def per_sample(s):
        s = s.astype(jnp.float32) / 255.0
        return (s - mean[:, None, None]) / std[:, None, None]

    transformed = [per_sample(samples[i]) for i in range(samples.shape[0])]
    batch = jnp.stack(transformed, axis=0)             # collate
    return jnp.clip(batch, -3.0, 3.0) * gamma + beta   # per_batch_transform


if __name__ == "__main__":
    key = jax.random.PRNGKey(0)
    N, C, H, W = 2, 4, 16, 16   # small NCHW "images"

    # deterministic synthetic inputs / parameters
    samples = jax.random.uniform(key, (N, C, H, W), jnp.float32, 0.0, 255.0)
    mean = jnp.array([0.485, 0.456, 0.406, 0.5], dtype=jnp.float32)
    std = jnp.array([0.229, 0.224, 0.225, 0.25], dtype=jnp.float32)
    gamma, beta = 2.0, 0.1

    out = preprocessor_forward(samples, mean, std, gamma, beta)
    out = jax.block_until_ready(out)

    ref = _reference_forward(samples, mean, std, gamma, beta)
    assert out.shape == (N, C, H, W)
    assert jnp.allclose(out, ref, atol=1e-5, rtol=1e-5)

    # TODO(synk): the original module accepts arbitrary Python sample types
    # (dicts, PIL images, etc.); only the tensor pipeline is expressible here.
    # TODO(synk): uint8 input / bf16 output would cut HBM traffic further, but
    # the reference consumer here expects float32, so both ends stay f32.
    print("KERNEL_OK")
</pallas_src>

<mosaic_0001>
module attributes {stable_mosaic.version = 11 : i64} {
  func.func @kernel(%arg0: i32, %arg1: i32, %arg2: memref<8x1xf32, #tpu.memory_space<vmem>>, %arg3: memref<8x1xf32, #tpu.memory_space<vmem>>, %arg4: memref<8x256xf32, #tpu.memory_space<vmem>>, %arg5: memref<8x256xf32, #tpu.memory_space<vmem>>) attributes {dimension_semantics = [#tpu.dimension_semantics<parallel>, #tpu.dimension_semantics<parallel>], iteration_bounds = array<i64: 1, 1>, scalar_prefetch = 0 : i64, scratch_operands = 0 : i64, tpu.core_type = #tpu.core_type<tc>, window_params = [{transform_indices = @transform_0, window_bounds = array<i64: 8, 1>}, {transform_indices = @transform_1, window_bounds = array<i64: 8, 1>}, {transform_indices = @transform_2, window_bounds = array<i64: 8, 256>}, {transform_indices = @transform_3, window_bounds = array<i64: 8, 256>}]} {
    %c0 = arith.constant 0 : index
    %c0_0 = arith.constant 0 : index
    %0 = vector.load %arg4[%c0, %c0_0] : memref<8x256xf32, #tpu.memory_space<vmem>>, vector<8x256xf32>
    %c0_1 = arith.constant 0 : index
    %c0_2 = arith.constant 0 : index
    %1 = vector.load %arg2[%c0_1, %c0_2] : memref<8x1xf32, #tpu.memory_space<vmem>>, vector<8x1xf32>
    %2 = vector.broadcast %1 : vector<8x1xf32> to vector<8x256xf32>
    %3 = arith.mulf %0, %2 : vector<8x256xf32>
    %c0_3 = arith.constant 0 : index
    %c0_4 = arith.constant 0 : index
    %4 = vector.load %arg3[%c0_3, %c0_4] : memref<8x1xf32, #tpu.memory_space<vmem>>, vector<8x1xf32>
    %5 = vector.broadcast %4 : vector<8x1xf32> to vector<8x256xf32>
    %6 = arith.addf %3, %5 : vector<8x256xf32>
    %cst = arith.constant -5.900000e+00 : f32
    %cst_5 = arith.constant 6.100000e+00 : f32
    %7 = vector.broadcast %cst : f32 to vector<8x256xf32>
    %8 = arith.maximumf %7, %6 : vector<8x256xf32>
    %9 = vector.broadcast %cst_5 : f32 to vector<8x256xf32>
    %10 = arith.minimumf %9, %8 : vector<8x256xf32>
    %c0_6 = arith.constant 0 : index
    %c0_7 = arith.constant 0 : index
    %11 = vector.load %arg5[%c0_6, %c0_7] : memref<8x256xf32, #tpu.memory_space<vmem>>, vector<8x256xf32>
    tpu.vector_store %arg5[%c0_6, %c0_7], %10 {strides = array<i32>} : memref<8x256xf32, #tpu.memory_space<vmem>>, vector<8x256xf32>,
    return
  }
  func.func @transform_0(%arg0: i32, %arg1: i32) -> (i32, i32) {
    %c0_i32 = arith.constant 0 : i32
    %c0_i32_0 = arith.constant 0 : i32
    return %arg0, %c0_i32 : i32, i32
  }
  func.func @transform_1(%arg0: i32, %arg1: i32) -> (i32, i32) {
    %c0_i32 = arith.constant 0 : i32
    %c0_i32_0 = arith.constant 0 : i32
    return %arg0, %c0_i32 : i32, i32
  }
  func.func @transform_2(%arg0: i32, %arg1: i32) -> (i32, i32) {
    %c0_i32 = arith.constant 0 : i32
    return %arg0, %arg1 : i32, i32
  }
  func.func @transform_3(%arg0: i32, %arg1: i32) -> (i32, i32) {
    %c0_i32 = arith.constant 0 : i32
    return %arg0, %arg1 : i32, i32
  }
}

</mosaic_0001>

<bundles_post_ra>
// kernel: tile.18
= control target key start
LH: loop header
LB: loop body
LE: loop exit
PB: predicated region body
PF: predicated region fallthrough
CT: control target
= control target key end

     0   :  { %s22_s0 = inlined_call_operand.vmem [shape: f32[4], index: 0, kind: input, shape index: {}]   ;;  %s23_s1 = inlined_call_operand.vmem [shape: f32[2,4], index: 1, kind: output, shape index: {}]  }
   0x1   :  { %v4_v0 = vld [vmem:[%s22_s0] ss:$0 sm:$0xff] }
   0x2   :  { %5 = vst [vmem:[%s23_s1] sm:$0x3] %v4_v0 }

// kernel: tile.0
= control target key start
LH: loop header
LB: loop body
LE: loop exit
PB: predicated region body
PF: predicated region fallthrough
CT: control target
= control target key end

     0   :  { %s34_s8 = smov 125   ;;  %vm7_vm0 = vcmask 7168   ;;  %s35_s11 = smov 126   ;;  %s61_s0 = inlined_call_operand.vmem [shape: f32[2,4], index: 0, kind: input, shape index: {}]   ;;  %s62_s1 = inlined_call_operand.vmem [shape: f32[8,1], index: 1, kind: output, shape index: {}]  }
   0x1   :  { %v4_v0 = vld [vmem:[%s61_s0] sm:$0x3]  ;;  %s33_s0 = smov 127  }
   0x2   :  { %5 = vst [vmem:[#allocation0] sm:$0x3] %v4_v0 }
   0x9   :  { %v9_v1 = vld [vmem:[#allocation0] sm:$0x3]  }
   0xa   :  { %v21_v2 = vld [vmem:[#allocation0] sm:$0x3]   ;;  %10 = vrot.lane.b32.xlu0 %v9_v1, %s33_s0 }
   0xb   :  { %22 = vrot.lane.b32.xlu1 %v21_v2, %s34_s8  ;;  %v6_v3 = vld [vmem:[#allocation0] sm:$0x3]  }
   0xc   :  { %v15_v4 = vld [vmem:[#allocation0] sm:$0x3]   ;;  %8 = vst.msk [vmem:[%s62_s1] ss:$4 sm:$0x3] %vm7_vm0, %v6_v3  }
   0xe   :  { %16 = vrot.lane.b32.xlu0 %v15_v4, %s35_s11 }
  0x7c   :  { %v11_v5 = vpop.permute.xlu0 %10  }
  0x7d   :  { %v23_v6 = vpop.permute.xlu1 %22   ;;  %27 = vst.msk [vmem:[%s62_s1 + $0x1] ss:$4 sm:$0x3] %vm7_vm0, %v11_v5  }
  0x7e   :  { %29 = vst.msk [vmem:[%s62_s1 + $0x3] ss:$4 sm:$0x3] %vm7_vm0, %v23_v6  }
  0x80   :  { %v17_v7 = vpop.permute.xlu0 %16  }
  0x81   :  { %28 = vst.msk [vmem:[%s62_s1 + $0x2] ss:$4 sm:$0x3] %vm7_vm0, %v17_v7  }

// kernel: preprocessor_forward.1
= control target key start
LH: loop header
LB: loop body
LE: loop exit
PB: predicated region body
PF: predicated region fallthrough
CT: control target
= control target key end

     0   :  { %v44_v0 = vmov 0   ;;  %s83_s0 = inlined_call_operand.vmem [shape: f32[8,1], index: 0, kind: input, shape index: {}]   ;;  %s84_s1 = inlined_call_operand.vmem [shape: f32[8,1], index: 1, kind: input, shape index: {}]   ;;  %s85_s2 = inlined_call_operand.vmem [shape: f32[8,256], index: 2, kind: input, shape index: {}]   ;;  %s86_s3 = inlined_call_operand.vmem [shape: f32[8,256], index: 3, kind: output, shape index: {}]  }
   0x1   :  { %43 = vset.pattern.permute.xlu0 %v44_v0  ;;  %v16_v1 = vld [vmem:[%s83_s0] sm:$0xff]  ;;  %v15_v4 = vld [vmem:[%s85_s2 + $0x8] sm:$0xff] }
   0x2   :  { %19 = vperm.xlu0 %43, %v16_v1   ;;  %v24_v2 = vld [vmem:[%s84_s1] sm:$0xff] }
   0x3   :  { %v14_v3 = vld [vmem:[%s85_s2] sm:$0xff] }
   0x6   :  { %27 = vperm.xlu0 %43, %v24_v2  }
  0x81   :  { %v20_v5 = vpop.permute.xlu0 %19 }
  0x82   :  { %v22_v6 = vmul.f32 %v20_v5, %v14_v3  ;;  %v23_v7 = vmul.f32 %v20_v5, %v15_v4 }
  0x85   :  { %v28_v8 = vpop.permute.xlu0 %27 }
  0x86   :  { %v30_v9 = vadd.f32 %v28_v8, %v22_v6  ;;  %v31_v10 = vadd.f32 %v28_v8, %v23_v7 }
  0x88   :  { %v32_v11 = vmax.f32 %v30_v9, -5.9  ;;  %v33_v12 = vmax.f32 %v31_v10, -5.9 }
  0x8a   :  { %v34_v13 = vmin.f32 %v32_v11, 6.1  ;;  %v35_v14 = vmin.f32 %v33_v12, 6.1 }
  0x8c   :  { %36 = vst [vmem:[%s86_s3] sm:$0xff] %v34_v13  ;;  %37 = vst [vmem:[%s86_s3 + $0x8] sm:$0xff] %v35_v14 }

</bundles_post_ra>
